<compile_context>
chip_gen: v7x
topology: tpu7x:2x2x1
jax: 0.10.0
libtpu: 0.0.40
codegen_flags: <defaults>
</compile_context>

<pallas_src>
import math

import jax
import jax.numpy as jnp
from jax.experimental import pallas as pl
from jax.experimental.pallas import tpu as pltpu


NUM_TIME_CHANNELS = 256  # diffusers Timesteps(num_channels=256)


# -----------------------------------------------------------------------------
# Pallas kernels
# -----------------------------------------------------------------------------
def _silu(x):
    return x * jax.nn.sigmoid(x)


def cond_kernel(tproj_ref, lab_ref, w1_ref, b1_ref, w2_ref, b2_ref, c_ref):
    """Grid-less prologue: conditioning vector c = SiLU(TimestepMLP(t_proj) + label_emb).

    Tiny ((B,256)@(256,D) + (B,D)@(D,D)); hoisted out of the gridded projection kernel so
    the w3 stream below carries no cross-step state and can run "parallel" on v7x megacore.
    """
    h = jnp.dot(tproj_ref[...], w1_ref[...],
                preferred_element_type=jnp.float32) + b1_ref[...]
    h = _silu(h)
    t_emb = jnp.dot(h.astype(w2_ref.dtype), w2_ref[...],
                    preferred_element_type=jnp.float32) + b2_ref[...]
    c_ref[...] = _silu(t_emb + lab_ref[...].astype(jnp.float32))


def proj_kernel(c_ref, w3_ref, b3_ref, chunks_ref):
    """Grid axis j in [0, 2): three (D -> D) slabs of the final 6*D projection per step.

    Pure bf16 weight stream + tiny MXU work; no state carried across steps, so the grid
    axis is "parallel" (v7x: one step per TensorCore, each with its own HBM path).
    """
    c = c_ref[...].astype(w3_ref.dtype)                       # (B, D) bf16
    for s in range(3):                                        # static unroll over the slab
        out = (jnp.dot(c, w3_ref[s], preferred_element_type=jnp.float32)
               + b3_ref[s])                                   # (B, D) f32
        chunks_ref[s] = out.astype(chunks_ref.dtype)


def norm_mod_kernel(x_ref, mods_ref, o_ref):
    """LayerNorm(eps=1e-6, no affine) + adaptive modulation on a (1, tT, D) tile."""
    x = x_ref[...].astype(jnp.float32)                        # (1, tT, D)
    inv_d = 1.0 / x.shape[-1]
    # Two-pass row statistics (robust against large |mean|; x tile is in VMEM so the
    # second pass is free on this HBM-bound kernel).
    mean = jnp.sum(x, axis=-1, keepdims=True) * inv_d
    xc = x - mean
    var = jnp.sum(xc * xc, axis=-1, keepdims=True) * inv_d
    xn = xc * jax.lax.rsqrt(var + 1e-6)

    mods = mods_ref[...]                                      # (1, 2, D), resident across seq tiles
    shift = mods[:, 0, :]                                     # (1, D)
    scale = mods[:, 1, :] + 1.0                               # (1, D): fold the "+1" here (free)
    o_ref[...] = (xn * scale + shift).astype(o_ref.dtype)


# -----------------------------------------------------------------------------
# Wrapper (plain-JAX glue + pallas_call invocations)
# -----------------------------------------------------------------------------
def _timestep_proj(timestep):
    # sinusoidal projection, flip_sin_to_cos=True, downscale_freq_shift=1
    half = NUM_TIME_CHANNELS // 2
    exponent = (-math.log(10000.0)
                * jnp.arange(half, dtype=jnp.float32) / (half - 1.0))
    freqs = jnp.exp(exponent)
    args = timestep.astype(jnp.float32)[:, None] * freqs[None, :]
    return jnp.concatenate([jnp.cos(args), jnp.sin(args)], axis=-1)  # (B, 256)


def _seq_tile(B, T, D, itemsize):
    """Sequence-tile rows for the norm kernel.

    Target large tiles (per-step overhead ~0.35us matters most at v7x's 3.2 TB/s); cap one
    block at ~8 MiB so 2 in + 2 out pipeline buffers stay under the raised VMEM limit.
    Always a multiple of 8 or equal to T (satisfies the (8,128) block rule).  When B == 1,
    keep >= 2 grid steps so both v7x TensorCores get work.
    """
    cap = max(8, ((8 * 1024 * 1024) // max(1, D * itemsize)) // 8 * 8)
    t = min(2048, cap)
    if T <= t:
        if B == 1 and T > 8:
            half = max(8, (((T + 1) // 2) + 7) // 8 * 8)
            return min(T, half)
        return T
    return t


def ada_layer_norm_zero(x, timestep, class_labels, params):
    B, T, D = x.shape
    t_proj = _timestep_proj(timestep).astype(params["w1"].dtype)    # (B, 256) bf16
    label_emb = params["emb_table"][class_labels]                   # (B, D) gather (glue)
    # TODO(synk): class-dropout / CFG token replacement is train-only; eval path implemented.

    # ---- Kernel 1 (prologue): conditioning MLP, single invocation, everything in VMEM ----
    c = pl.pallas_call(
        cond_kernel,
        out_shape=jax.ShapeDtypeStruct((B, D), jnp.float32),
    )(t_proj, label_emb, params["w1"], params["b1"], params["w2"], params["b2"])

    # ---- Kernel 2: 6*D projection, w3 streamed 3 slabs/step, chunk axis "parallel" ----
    # (On v6e/v5e's 128 MiB VMEM the whole w3 could be held resident in one step; the
    #  3-slab stream is within a couple of grid-step overheads of that and fits all gens.)
    chunks = pl.pallas_call(
        proj_kernel,
        out_shape=jax.ShapeDtypeStruct((6, B, D), jnp.float32),
        grid=(2,),
        in_specs=[
            pl.BlockSpec((B, D), lambda j: (0, 0)),               # c (tiny, resident)
            pl.BlockSpec((3, D, D), lambda j: (j, 0, 0)),         # w3 slabs (streamed)
            pl.BlockSpec((3, 1, D), lambda j: (j, 0, 0)),         # b3 slabs
        ],
        out_specs=pl.BlockSpec((3, B, D), lambda j: (j, 0, 0)),
        compiler_params=pltpu.CompilerParams(
            dimension_semantics=("parallel",),       # v7x: one step per TensorCore
            vmem_limit_bytes=32 * 1024 * 1024),
    )(c, params["w3"], params["b3"])

    shift_msa, scale_msa = chunks[0], chunks[1]
    gate_msa, shift_mlp, scale_mlp, gate_mlp = (chunks[2], chunks[3],
                                                chunks[4], chunks[5])
    # Tiny (B,2,D) stack so the norm kernel gets a lane-dense, constraint-friendly block.
    mods = jnp.stack([shift_msa, scale_msa], axis=1)                # (B, 2, D) f32

    # ---- Kernel 3: LayerNorm + modulation, tiled over (batch, seq) ----
    # NOTE: feeding bf16 x (and bf16 out_shape) halves the HBM stream of this kernel on
    # every generation if the surrounding model tolerates it; dtype follows the input here.
    tT = _seq_tile(B, T, D, jnp.dtype(x.dtype).itemsize)
    x_out = pl.pallas_call(
        norm_mod_kernel,
        out_shape=jax.ShapeDtypeStruct((B, T, D), x.dtype),
        grid=(B, pl.cdiv(T, tT)),
        in_specs=[pl.BlockSpec((1, tT, D), lambda b, t: (b, t, 0)),
                  pl.BlockSpec((1, 2, D), lambda b, t: (b, 0, 0))],   # resident across seq tiles
        out_specs=pl.BlockSpec((1, tT, D), lambda b, t: (b, t, 0)),
        compiler_params=pltpu.CompilerParams(
            dimension_semantics=("parallel", "parallel"),  # shards across v7x's 2 TCs
            vmem_limit_bytes=48 * 1024 * 1024),            # 2 in + 2 out ~8 MiB blocks + slack
    )(x, mods)

    return x_out, gate_msa, shift_mlp, scale_mlp, gate_mlp


# -----------------------------------------------------------------------------
# Deterministic parameter init (shapes from the module __init__; synthetic values)
# Weights are stored in bf16 (halves HBM weight traffic); biases/table stay f32.
# -----------------------------------------------------------------------------
def init_params(key, embedding_dim, num_embeddings):
    D = embedding_dim
    ks = jax.random.split(key, 7)

    def unif(k, shape, fan_in):
        bound = 1.0 / math.sqrt(fan_in)
        return jax.random.uniform(k, shape, jnp.float32, -bound, bound)

    return {
        # LabelEmbedding table (num_classes + 1 for the CFG "drop" token)
        "emb_table": jax.random.normal(ks[0], (num_embeddings + 1, D), jnp.float32),
        # TimestepEmbedding: Linear(256, D), Linear(D, D)   (stored as (in, out), bf16)
        "w1": unif(ks[1], (NUM_TIME_CHANNELS, D), NUM_TIME_CHANNELS).astype(jnp.bfloat16),
        "b1": unif(ks[2], (1, D), NUM_TIME_CHANNELS),
        "w2": unif(ks[3], (D, D), D).astype(jnp.bfloat16),
        "b2": unif(ks[4], (1, D), D),
        # self.linear: Linear(D, 6*D), stored as 6 slabs of (D, D) for per-chunk streaming
        "w3": unif(ks[5], (6, D, D), D).astype(jnp.bfloat16),
        "b3": unif(ks[6], (6, 1, D), D),
    }


# -----------------------------------------------------------------------------
# Pure-JAX reference (mirrors the kernel's mixed precision: bf16 weights, f32 accumulation)
# -----------------------------------------------------------------------------
def reference(x, timestep, class_labels, params):
    f32 = jnp.float32
    t_proj = _timestep_proj(timestep).astype(params["w1"].dtype)
    h = jnp.dot(t_proj, params["w1"], preferred_element_type=f32) + params["b1"]
    h = jax.nn.silu(h)
    t_emb = jnp.dot(h.astype(params["w2"].dtype), params["w2"],
                    preferred_element_type=f32) + params["b2"]
    cond = t_emb + params["emb_table"][class_labels]
    c = jax.nn.silu(cond)
    chunks = [jnp.dot(c.astype(params["w3"].dtype), params["w3"][j],
                      preferred_element_type=f32) + params["b3"][j]
              for j in range(6)]
    shift_msa, scale_msa, gate_msa, shift_mlp, scale_mlp, gate_mlp = chunks
    mean = jnp.mean(x, -1, keepdims=True)
    var = jnp.mean(jnp.square(x - mean), -1, keepdims=True)
    xn = (x - mean) / jnp.sqrt(var + 1e-6)
    x_out = xn * (1.0 + scale_msa[:, None, :]) + shift_msa[:, None, :]
    return x_out, gate_msa, shift_mlp, scale_mlp, gate_mlp


if __name__ == "__main__":
    embedding_dim = 32
    num_embeddings = 10          # number of class labels
    B, T = 2, 8                  # batch, sequence length

    key = jax.random.PRNGKey(0)
    kp, kx = jax.random.split(key, 2)
    params = init_params(kp, embedding_dim, num_embeddings)

    x = jax.random.normal(kx, (B, T, embedding_dim), jnp.float32)
    timestep = jnp.array([3.0, 500.0], dtype=jnp.float32)
    class_labels = jnp.array([1, 7], dtype=jnp.int32)

    outs = ada_layer_norm_zero(x, timestep, class_labels, params)
    outs = jax.block_until_ready(outs)

    refs = reference(x, timestep, class_labels, params)
    for got, want in zip(outs, refs):
        assert got.shape == want.shape, (got.shape, want.shape)
        assert jnp.allclose(got, want, atol=1e-3, rtol=1e-3), (
            float(jnp.max(jnp.abs(got - want))))

    print("KERNEL_OK")
</pallas_src>

<mosaic_0001>
module attributes {stable_mosaic.version = 11 : i64} {
  func.func @cond_kernel(%arg0: memref<2x256xbf16, #tpu.memory_space<vmem>>, %arg1: memref<2x32xf32, #tpu.memory_space<vmem>>, %arg2: memref<256x32xbf16, #tpu.memory_space<vmem>>, %arg3: memref<1x32xf32, #tpu.memory_space<vmem>>, %arg4: memref<32x32xbf16, #tpu.memory_space<vmem>>, %arg5: memref<1x32xf32, #tpu.memory_space<vmem>>, %arg6: memref<2x32xf32, #tpu.memory_space<vmem>>) attributes {dimension_semantics = [], scalar_prefetch = 0 : i64, scratch_operands = 0 : i64, tpu.core_type = #tpu.core_type<tc>} {
    %c0 = arith.constant 0 : index
    %c0_0 = arith.constant 0 : index
    %0 = vector.load %arg0[%c0, %c0_0] : memref<2x256xbf16, #tpu.memory_space<vmem>>, vector<2x256xbf16>
    %c0_1 = arith.constant 0 : index
    %c0_2 = arith.constant 0 : index
    %1 = vector.load %arg2[%c0_1, %c0_2] : memref<256x32xbf16, #tpu.memory_space<vmem>>, vector<256x32xbf16>
    %cst = arith.constant dense<0.000000e+00> : vector<2x32xf32>
    %2 = tpu.matmul %0, %1, %cst {dimension_numbers = #tpu.dot_dimension_numbers<[1], [0], [0], [1], [0, 0, 1, 1], [], []>} : vector<2x256xbf16>, vector<256x32xbf16>, vector<2x32xf32> -> vector<2x32xf32>
    %c0_3 = arith.constant 0 : index
    %c0_4 = arith.constant 0 : index
    %3 = vector.load %arg3[%c0_3, %c0_4] : memref<1x32xf32, #tpu.memory_space<vmem>>, vector<1x32xf32>
    %4 = vector.broadcast %3 : vector<1x32xf32> to vector<2x32xf32>
    %5 = arith.addf %2, %4 : vector<2x32xf32>
    %6 = arith.negf %5 : vector<2x32xf32>
    %7 = math.exp %6 : vector<2x32xf32>
    %cst_5 = arith.constant 1.000000e+00 : f32
    %8 = vector.broadcast %cst_5 : f32 to vector<2x32xf32>
    %9 = arith.addf %8, %7 : vector<2x32xf32>
    %10 = arith.divf %8, %9 : vector<2x32xf32>
    %11 = arith.mulf %5, %10 : vector<2x32xf32>
    %12 = arith.truncf %11 : vector<2x32xf32> to vector<2x32xbf16>
    %c0_6 = arith.constant 0 : index
    %c0_7 = arith.constant 0 : index
    %13 = vector.load %arg4[%c0_6, %c0_7] : memref<32x32xbf16, #tpu.memory_space<vmem>>, vector<32x32xbf16>
    %cst_8 = arith.constant dense<0.000000e+00> : vector<2x32xf32>
    %14 = tpu.matmul %12, %13, %cst_8 {dimension_numbers = #tpu.dot_dimension_numbers<[1], [0], [0], [1], [0, 0, 1, 1], [], []>} : vector<2x32xbf16>, vector<32x32xbf16>, vector<2x32xf32> -> vector<2x32xf32>
    %c0_9 = arith.constant 0 : index
    %c0_10 = arith.constant 0 : index
    %15 = vector.load %arg5[%c0_9, %c0_10] : memref<1x32xf32, #tpu.memory_space<vmem>>, vector<1x32xf32>
    %16 = vector.broadcast %15 : vector<1x32xf32> to vector<2x32xf32>
    %17 = arith.addf %14, %16 : vector<2x32xf32>
    %c0_11 = arith.constant 0 : index
    %c0_12 = arith.constant 0 : index
    %18 = vector.load %arg1[%c0_11, %c0_12] : memref<2x32xf32, #tpu.memory_space<vmem>>, vector<2x32xf32>
    %19 = arith.addf %17, %18 : vector<2x32xf32>
    %20 = arith.negf %19 : vector<2x32xf32>
    %21 = math.exp %20 : vector<2x32xf32>
    %cst_13 = arith.constant 1.000000e+00 : f32
    %22 = vector.broadcast %cst_13 : f32 to vector<2x32xf32>
    %23 = arith.addf %22, %21 : vector<2x32xf32>
    %24 = arith.divf %22, %23 : vector<2x32xf32>
    %25 = arith.mulf %19, %24 : vector<2x32xf32>
    %c0_14 = arith.constant 0 : index
    %c0_15 = arith.constant 0 : index
    %26 = vector.load %arg6[%c0_14, %c0_15] : memref<2x32xf32, #tpu.memory_space<vmem>>, vector<2x32xf32>
    tpu.vector_store %arg6[%c0_14, %c0_15], %25 {strides = array<i32>} : memref<2x32xf32, #tpu.memory_space<vmem>>, vector<2x32xf32>,
    return
  }
}

</mosaic_0001>

<bundles_post_ra>
// kernel: tpu_custom_call.1
= control target key start
LH: loop header
LB: loop body
LE: loop exit
PB: predicated region body
PF: predicated region fallthrough
CT: control target
= control target key end

     0   :  { %v77_v8 = vlaneseq  ;;  %v437_v14 = vmov 1966171168   ;;  %s554_s0 = inlined_call_operand.vmem [shape: bf16[2,256], index: 0, kind: input, shape index: {}]   ;;  %s555_s1 = inlined_call_operand.vmem [shape: f32[2,32], index: 1, kind: input, shape index: {}]   ;;  %s556_s2 = inlined_call_operand.vmem [shape: bf16[256,32], index: 2, kind: input, shape index: {}]   ;;  %s557_s3 = inlined_call_operand.vmem [shape: f32[1,32], index: 3, kind: input, shape index: {}]   ;;  %s558_s4 = inlined_call_operand.vmem [shape: bf16[32,32], index: 4, kind: input, shape index: {}]   ;;  %s559_s5 = inlined_call_operand.vmem [shape: f32[1,32], index: 5, kind: input, shape index: {}]   ;;  %s560_s6 = inlined_call_operand.hbm [shape: f32[2,32], index: 6, kind: output, shape index: {}]  }
   0x1   :  { %v387_v0 = vld [vmem:[%s556_s2 + $0x40] sm:$0xff]   ;;  %v389_v2 = vld [vmem:[%s556_s2 + $0x48] sm:$0xff]   ;;  %v391_v4 = vld [vmem:[%s556_s2 + $0x50] sm:$0xff]   ;;  %v75_v15 = vunpack.c.l.s4 %v437_v14 }
   0x2   :  { %v388_v1 = vld [vmem:[%s556_s2] sm:$0xff]   ;;  %350 = vmatprep.subr.bf16.mxu0 %v387_v0  ;;  %v390_v3 = vld [vmem:[%s556_s2 + $0x8] sm:$0xff]   ;;  %v392_v5 = vld [vmem:[%s556_s2 + $0x10] sm:$0xff]   ;;  %v78_v12 = vshrl.u32 %v77_v8, 7 }
   0x3   :  { %351 = vmatpush3.bf16.msra.mxu0 %v388_v1  ;;  %v393_v6 = vld [vmem:[%s556_s2 + $0x58] sm:$0xff]   ;;  %v395_v9 = vld [vmem:[%s556_s2 + $0x60] sm:$0xff]   ;;  %v397_v11 = vld [vmem:[%s556_s2 + $0x68] sm:$0xff]  }
   0x4   :  { %352 = vmatprep.subr.bf16.mxu0 %v389_v2  ;;  %v394_v7 = vld [vmem:[%s556_s2 + $0x18] sm:$0xff]   ;;  %v396_v10 = vld [vmem:[%s556_s2 + $0x20] sm:$0xff]  }
   0x5   :  { %v327_v13 = vld.sshfl [vmem:[%s554_s0] sm:$0x11 pattern:$0x75316420] }
   0x7   :  { %353 = vmatpush3.bf16.msra.mxu0 %v390_v3 }
   0x8   :  { %354 = vmatprep.subr.bf16.mxu0 %v391_v4 }
   0xb   :  { %355 = vmatpush3.bf16.msra.mxu0 %v392_v5 }
   0xc   :  { %356 = vmatprep.subr.bf16.mxu0 %v393_v6 }
   0xf   :  { %357 = vmatpush3.bf16.msra.mxu0 %v394_v7 }
  0x10   :  { %358 = vmatprep.subr.bf16.mxu0 %v395_v9 }
  0x11   :  { %11 = vsyncpa [#allocation3], 0  ;;  %v398_v16 = vld [vmem:[%s556_s2 + $0x28] sm:$0xff]   ;;  %v73_v17 = vcombine.high %v327_v13, %v327_v13  ;;  %v76_v18 = vunpack.c.0.s8 %v75_v15  ;;  %v399_v19 = vld [vmem:[%s556_s2 + $0x70] sm:$0xff]   ;;  %v438_v27 = vmov 0.0   ;;  %vm439_vm0 = vmmov 0  }
  0x12   :  { %v400_v21 = vld [vmem:[%s556_s2 + $0x30] sm:$0xff]   ;;  %v401_v23 = vld [vmem:[%s556_s2 + $0x78] sm:$0xff]   ;;  %v403_v26 = vld [vmem:[%s558_s4] sm:$0xff]   ;;  %375 = vmatprep.subr.bf16.mxu1 %v438_v27  ;;  %379 = vmatprep.mubr.msk.bf16.mxu1 %vm439_vm0, %v438_v27  ;;  %vm257_vm1 = vcmask 261120   ;;  %s440_s13 = smov [#allocation2]   ;;  %vm310_vm2 = vcmask 254976  }
  0x13   :  { %359 = vmatpush3.bf16.msra.mxu0 %v396_v10  ;;  %v79_v20 = vsub.s32 %v76_v18, %v78_v12  ;;  %v402_v24 = vld [vmem:[%s556_s2 + $0x38] sm:$0xff]   ;;  %376 = vmatpush3.bf16.msra.mxu1 %v403_v26  ;;  %v404_v28 = vld [vmem:[%s558_s4 + $0x8] sm:$0xff]   ;;  %v326_v30 = vld [vmem:[%s557_s3] ss:$0 sm:$0xff]  ;;  %s318_s14 = sshll.u32 %s440_s13, 4  ;;  %s319_s14 = int_to_ptr.vmem [resolvable:$true] %s318_s14 }
  0x14   :  { %360 = vmatprep.subr.bf16.mxu0 %v397_v11  ;;  %377 = vmatprep.subr.bf16.mxu1 %v438_v27  ;;  %v345_v42 = vld [vmem:[%s559_s5] ss:$0 sm:$0xff]  ;;  %s413_s5 = scalar_lea.vmem %s319_s14, 32  ;;  %p418_p1 = scmp.lt.s32.totalorder %s319_s14, %s319_s14 }
  0x15   :  { %v87_v22 = vrot.slane %v73_v17, %v79_v20  ;;  %v80_v25 = vrot.slane %v327_v13, %v79_v20  ;;  %v301_v44 = vld [vmem:[%s555_s1] sm:$0x3]  ;;  %p414_p0 = scmp.ne.s32.totalorder %s319_s14, %s413_s5  ;;  %p419_p2 = scmp.lt.s32.totalorder %s413_s5, %s413_s5 }
  0x17   :  { %361 = vmatpush3.bf16.msra.mxu0 %v398_v16  ;;  %218 = vmatprep.mubr.bf16.mxu0 %v87_v22  ;;  %p420_p3 = por %p419_p2, %p418_p1 }
  0x18   :  { %362 = vmatprep.subr.bf16.mxu0 %v399_v19  ;;  %378 = vmatpush3.bf16.msra.mxu1 %v404_v28 }
  0x19   :  { %p421_p4 = pnand %p420_p3, %p414_p0 }
  0x1b   :  { %363 = vmatpush3.bf16.msra.mxu0 %v400_v21 }
  0x1c   :  { %364 = vmatprep.subr.bf16.mxu0 %v401_v23 }
  0x1f   :  { %365 = vmatpush3.bf16.msra.mxu0 %v402_v24 }
  0x22   :  { %219 = vmatmul.mubr.bf16.vlgmr.msra.gmra.mrb[0].mxu0 %v80_v25 }
  0xf5   :  { %v366_v29 = vpop.f32.mrb[0].mxu0 }
  0xf6   :  { %v367_v31 = vpop.f32.mrb[1].mxu0 }
  0xf7   :  { %v368_v32 = vadd.f32 %v367_v31, %v366_v29  ;;  %v369_v33 = vpop.f32.mrb[2].mxu0 }
  0xf8   :  { %v370_v34 = vpop.f32.mrb[3].mxu0 }
  0xf9   :  { %v221_v35 = vadd.f32 %v368_v32, %v326_v30 }
  0xfb   :  { %v344_v36 = vmul.f32 -1.442695, %v221_v35 }
  0xfd   :  { %405 = vpow2.f32 %v344_v36 }
 0x107   :  { %v406_v37 = vpop.eup %405 }
 0x108   :  { %v229_v38 = vadd.f32 1.0, %v406_v37 }
 0x10a   :  { %407 = vrcp.f32 %v229_v38 }
 0x114   :  { %v408_v39 = vpop.eup %407 }
 0x115   :  { %v232_v40 = vmul.f32 %v408_v39, %v221_v35 }
 0x117   :  { %v233_v41 = vpack.c.bf16 %v232_v40, %v232_v40 }
 0x119   :  { %380 = vmatmul.mubr.msk.bf16.vlgmr.msra.gmra.mrb[0].mxu1 %vm257_vm1, %v233_v41 }
 0x1ec   :  { %v295_v43 = vpop.f32.mrb[0].mxu1 }
 0x1ed   :  { %v296_v45 = vadd.f32 %v345_v42, %v295_v43  ;;  %v381_v46 = vpop.f32.mrb[1].mxu1 }
 0x1ee   :  { %v298_v47 = vpop.f32.mrb[2].mxu1 }
 0x1ef   :  { %v302_v48 = vadd.f32 %v301_v44, %v296_v45  ;;  %v382_v49 = vpop.f32.mrb[3].mxu1 }
 0x1f1   :  { %v349_v50 = vmul.f32 -1.442695, %v302_v48 }
 0x1f3   :  { %409 = vpow2.f32 %v349_v50 }
 0x1fd   :  { %v410_v51 = vpop.eup %409 }
 0x1fe   :  { %v306_v52 = vadd.f32 1.0, %v410_v51 }
 0x200   :  { %411 = vrcp.f32 %v306_v52 }
 0x20a   :  { %v412_v53 = vpop.eup %411 }
 0x20b   :  { %v309_v54 = vmul.f32 %v412_v53, %v302_v48 }
 0x20d   :  { %311 = vst.msk [vmem:[#allocation2] sm:$0x3] %vm310_vm2, %v309_v54 }
 0x20e   :  { %424 = shalt.err (!%p421_p4)
}
 0x20f   :  { %s425_s16 = scalar_lea.hbm %s560_s6, 32 }
 0x210   :  { %p426_p5 = scmp.ne.s32.totalorder %s560_s6, %s425_s16  ;;  %p429_p6 = scmp.lt.u32.totalorder %s425_s16, %s560_s6 }
 0x212   :  { %p431_p7 = pnand %p429_p6, %p426_p5 }
 0x214   :  { %434 = shalt.err (!%p431_p7)
}
 0x215   :  { %321 = dma.vmem_to_hbm [thread:$0]  %s319_s14, 32, %s560_s6, [#allocation3]  }
 0x216   :  { %435 = dma.done.wait [#allocation3], 32  }
 0x217   :  { %436 = vsyncadd [#allocation3], 4294967264 }
 0x218   :  { %325 = vsyncpa [#allocation3], 1 }

</bundles_post_ra>
